<compile_context>
chip_gen: v7x
topology: tpu7x:2x2x1
jax: 0.10.0
libtpu: 0.0.40
codegen_flags: <defaults>
</compile_context>

<pallas_src>
import math
import functools

import jax
import jax.numpy as jnp
from jax.experimental import pallas as pl
from jax.experimental.pallas import tpu as pltpu


_VMEM_LIMIT = 48 * 1024 * 1024  # safe on v5e/v6e (128 MiB) and v7x (64 MiB)


def _round_up(n, m):
    return ((n + m - 1) // m) * m


def _tile(dim, pref, align):
    """Largest block <= pref that is a multiple of `align` and divides `dim`;
    falls back to the full dim (full-extent blocks are always legal)."""
    if dim <= pref:
        return dim
    t = (pref // align) * align
    while t >= align:
        if dim % t == 0:
            return t
        t -= align
    return dim


# -----------------------------------------------------------------------------
# Kernels
# -----------------------------------------------------------------------------
def _mm_bias_kernel(x_ref, w_ref, b_ref, o_ref, acc_ref, *, relu):
    k = pl.program_id(2)

    @pl.when(k == 0)
    def _():
        acc_ref[...] = jnp.zeros_like(acc_ref)

    acc_ref[...] += jnp.dot(x_ref[...], w_ref[...],
                            preferred_element_type=jnp.float32)

    @pl.when(k == pl.num_programs(2) - 1)
    def _():
        y = acc_ref[...] + b_ref[...].astype(jnp.float32)
        if relu:
            y = jnp.maximum(y, 0.0)
        o_ref[...] = y.astype(o_ref.dtype)


def _mm_res_ln_kernel(x_ref, w_ref, b_ref, r_ref, g_ref, be_ref,
                      o_ref, acc_ref, *, eps):
    k = pl.program_id(1)

    @pl.when(k == 0)
    def _():
        acc_ref[...] = jnp.zeros_like(acc_ref)

    acc_ref[...] += jnp.dot(x_ref[...], w_ref[...],
                            preferred_element_type=jnp.float32)

    @pl.when(k == pl.num_programs(1) - 1)
    def _():
        y = (acc_ref[...] + b_ref[...].astype(jnp.float32)
             + r_ref[...].astype(jnp.float32))
        mu = jnp.mean(y, axis=-1, keepdims=True)
        var = jnp.mean((y - mu) ** 2, axis=-1, keepdims=True)
        yn = (y - mu) * jax.lax.rsqrt(var + eps)
        o_ref[...] = (yn * g_ref[...].astype(jnp.float32)
                      + be_ref[...].astype(jnp.float32)).astype(o_ref.dtype)


def _attention_kernel(qkv_ref, o_ref, *, num_heads, d_k, scale):
    T = qkv_ref.shape[1]
    hd = num_heads * d_k
    qkv = qkv_ref[0]                                     # (T, 3*hd) bf16
    # causal mask generated in-kernel: no (T, T) HBM input
    row = jax.lax.broadcasted_iota(jnp.int32, (T, T), 0)
    col = jax.lax.broadcasted_iota(jnp.int32, (T, T), 1)
    causal = row >= col
    outs = []
    for h in range(num_heads):                           # unrolled at trace time
        q = qkv[:, h * d_k:(h + 1) * d_k]
        k = qkv[:, hd + h * d_k:hd + (h + 1) * d_k]
        v = qkv[:, 2 * hd + h * d_k:2 * hd + (h + 1) * d_k]
        s = jnp.dot(q, k.T, preferred_element_type=jnp.float32) * scale
        s = jnp.where(causal, s, -1e9)
        s = s - jnp.max(s, axis=-1, keepdims=True)
        p = jnp.exp(s)
        p = p * pl.reciprocal(jnp.sum(p, axis=-1, keepdims=True), approx=True)
        outs.append(jnp.dot(p.astype(v.dtype), v,
                            preferred_element_type=jnp.float32))
    # one lane-dense (T, H*dk) store instead of H strided (T, dk) stores
    o_ref[0] = jnp.concatenate(outs, axis=-1).astype(o_ref.dtype)


def _ln_matmul_kernel(x_ref, g_ref, be_ref, w_ref, b_ref, o_ref, *, eps):
    x = x_ref[...].astype(jnp.float32)
    mu = jnp.mean(x, axis=-1, keepdims=True)
    var = jnp.mean((x - mu) ** 2, axis=-1, keepdims=True)
    xn = ((x - mu) * jax.lax.rsqrt(var + eps)
          * g_ref[...].astype(jnp.float32) + be_ref[...].astype(jnp.float32))
    y = (jnp.dot(xn.astype(w_ref.dtype), w_ref[...],
                 preferred_element_type=jnp.float32)
         + b_ref[...].astype(jnp.float32))
    o_ref[...] = y.astype(o_ref.dtype)


# -----------------------------------------------------------------------------
# Wrappers
# -----------------------------------------------------------------------------
def pallas_matmul_bias(x, w, b, *, relu=False, out_dtype=jnp.bfloat16):
    """y = x @ w + b (+ ReLU).  x:(M,K) bf16, w:(K,N) bf16, b:(N,) f32."""
    M, K = x.shape
    N = w.shape[1]
    tm = _tile(M, 256, 8)
    tn = _tile(N, 256, 128)
    tk = _tile(K, 512, 128)
    kernel = functools.partial(_mm_bias_kernel, relu=relu)
    return pl.pallas_call(
        kernel,
        out_shape=jax.ShapeDtypeStruct((M, N), out_dtype),
        grid=(M // tm, N // tn, K // tk),
        in_specs=[
            pl.BlockSpec((tm, tk), lambda i, j, k: (i, k)),
            pl.BlockSpec((tk, tn), lambda i, j, k: (k, j)),
            pl.BlockSpec((1, tn), lambda i, j, k: (0, j)),
        ],
        out_specs=pl.BlockSpec((tm, tn), lambda i, j, k: (i, j)),
        scratch_shapes=[pltpu.VMEM((tm, tn), jnp.float32)],
        compiler_params=pltpu.CompilerParams(
            dimension_semantics=("parallel", "parallel", "arbitrary"),
            vmem_limit_bytes=_VMEM_LIMIT,
        ),
    )(x, w, b.reshape(1, N))


def pallas_matmul_residual_ln(x, w, b, res, gamma, beta, *, eps=1e-5,
                              out_dtype=jnp.bfloat16):
    """y = LayerNorm(res + x @ w + b); N (= d_model) kept resident for the LN."""
    M, K = x.shape
    N = w.shape[1]
    tm = _tile(M, 256, 8)
    tk = _tile(K, 512, 128)
    kernel = functools.partial(_mm_res_ln_kernel, eps=eps)
    return pl.pallas_call(
        kernel,
        out_shape=jax.ShapeDtypeStruct((M, N), out_dtype),
        grid=(M // tm, K // tk),
        in_specs=[
            pl.BlockSpec((tm, tk), lambda i, k: (i, k)),
            pl.BlockSpec((tk, N), lambda i, k: (k, 0)),
            pl.BlockSpec((1, N), lambda i, k: (0, 0)),
            pl.BlockSpec((tm, N), lambda i, k: (i, 0)),
            pl.BlockSpec((1, N), lambda i, k: (0, 0)),
            pl.BlockSpec((1, N), lambda i, k: (0, 0)),
        ],
        out_specs=pl.BlockSpec((tm, N), lambda i, k: (i, 0)),
        scratch_shapes=[pltpu.VMEM((tm, N), jnp.float32)],
        compiler_params=pltpu.CompilerParams(
            dimension_semantics=("parallel", "arbitrary"),
            vmem_limit_bytes=_VMEM_LIMIT,
        ),
    )(x, w, b.reshape(1, N), res, gamma.reshape(1, N), beta.reshape(1, N))


def pallas_attention(qkv, num_heads, d_k, *, out_dtype=jnp.bfloat16):
    """qkv:(B, T, 3*H*dk) bf16 -> (B, T, H*dk) causal MHA output."""
    B, T, three_hd = qkv.shape
    hd = num_heads * d_k
    kernel = functools.partial(_attention_kernel, num_heads=num_heads,
                               d_k=d_k, scale=1.0 / math.sqrt(d_k))
    return pl.pallas_call(
        kernel,
        out_shape=jax.ShapeDtypeStruct((B, T, hd), out_dtype),
        grid=(B,),
        in_specs=[pl.BlockSpec((1, T, three_hd), lambda b: (b, 0, 0))],
        out_specs=pl.BlockSpec((1, T, hd), lambda b: (b, 0, 0)),
        compiler_params=pltpu.CompilerParams(
            dimension_semantics=("parallel",),
            vmem_limit_bytes=_VMEM_LIMIT,
        ),
    )(qkv)


def pallas_ln_matmul(x, gamma, beta, w, b, *, eps=1e-5, out_dtype=jnp.float32):
    """y = LayerNorm(x) @ w + b.  Final LN fused as prologue of the tied head."""
    M, D = x.shape
    N = w.shape[1]
    tm = _tile(M, 256, 8)
    tn = _tile(N, 512, 128)
    kernel = functools.partial(_ln_matmul_kernel, eps=eps)
    return pl.pallas_call(
        kernel,
        out_shape=jax.ShapeDtypeStruct((M, N), out_dtype),
        grid=(M // tm, N // tn),
        in_specs=[
            pl.BlockSpec((tm, D), lambda i, j: (i, 0)),
            pl.BlockSpec((1, D), lambda i, j: (0, 0)),
            pl.BlockSpec((1, D), lambda i, j: (0, 0)),
            pl.BlockSpec((D, tn), lambda i, j: (0, j)),
            pl.BlockSpec((1, tn), lambda i, j: (0, j)),
        ],
        out_specs=pl.BlockSpec((tm, tn), lambda i, j: (i, j)),
        compiler_params=pltpu.CompilerParams(
            dimension_semantics=("parallel", "parallel"),
            vmem_limit_bytes=_VMEM_LIMIT,
        ),
    )(x, gamma.reshape(1, D), beta.reshape(1, D), w, b.reshape(1, N))


# -----------------------------------------------------------------------------
# Parameters (deterministic, xavier-uniform-like) and positional encoding
# -----------------------------------------------------------------------------
def xavier(key, shape, dtype=jnp.float32):
    fan_in, fan_out = shape[0], shape[1]
    lim = math.sqrt(6.0 / (fan_in + fan_out))
    return jax.random.uniform(key, shape, jnp.float32, -lim, lim).astype(dtype)


def init_params(key, vocab, d_model, num_heads, d_k, layers, d_ff):
    params = {}
    hd = num_heads * d_k
    key, k_emb = jax.random.split(key)
    emb = xavier(k_emb, (vocab, d_model))           # tied table (f32 master copy)
    params["emb"] = emb.astype(jnp.bfloat16)
    # Tied head (linear.weight == embedding): pre-transposed and lane-padded to a
    # multiple of 128 so the logits matmul writes dense tiles with no per-call
    # transpose of the embedding table.
    vpad = _round_up(vocab, 128)
    head_w = jnp.zeros((d_model, vpad), jnp.float32).at[:, :vocab].set(emb.T)
    params["head_w"] = head_w.astype(jnp.bfloat16)
    params["head_b"] = jnp.zeros((vpad,), jnp.float32)
    params["lnf_g"] = jnp.ones((d_model,), jnp.float32)
    params["lnf_b"] = jnp.zeros((d_model,), jnp.float32)
    params["layers"] = []
    for _ in range(layers):
        key, kq, kk, kv, ko, k1, k2 = jax.random.split(key, 7)
        wq = xavier(kq, (d_model, hd))
        wk = xavier(kk, (d_model, hd))
        wv = xavier(kv, (d_model, hd))
        layer = dict(
            wqkv=jnp.concatenate([wq, wk, wv], axis=1).astype(jnp.bfloat16),
            bqkv=jnp.zeros((3 * hd,), jnp.float32),
            wo=xavier(ko, (hd, d_model), jnp.bfloat16),
            bo=jnp.zeros((d_model,), jnp.float32),
            ln1_g=jnp.ones((d_model,), jnp.float32),
            ln1_b=jnp.zeros((d_model,), jnp.float32),
            w1=xavier(k1, (d_model, d_ff), jnp.bfloat16),
            b1=jnp.zeros((d_ff,), jnp.float32),
            w2=xavier(k2, (d_ff, d_model), jnp.bfloat16),
            b2=jnp.zeros((d_model,), jnp.float32),
            ln2_g=jnp.ones((d_model,), jnp.float32),
            ln2_b=jnp.zeros((d_model,), jnp.float32),
        )
        params["layers"].append(layer)
    return params


def sinusoidal_pe(max_len, d_model):
    pos = jnp.arange(max_len, dtype=jnp.float32)[:, None]
    i = jnp.arange(d_model, dtype=jnp.float32)[None, :]
    angle = pos / jnp.power(10000.0, (2.0 * jnp.floor(i / 2.0)) / d_model)
    return jnp.where((jnp.arange(d_model) % 2)[None, :] == 0,
                     jnp.sin(angle), jnp.cos(angle))


# -----------------------------------------------------------------------------
# Forward pass (src_seq=None branch of Transformer.forward)
# -----------------------------------------------------------------------------
def transformer_forward(params, trg_seq, *, d_model, num_heads, d_k, pe):
    B, T = trg_seq.shape
    D = d_model
    hd = num_heads * d_k

    # embedding gather + sinusoidal PE (XLA glue); trg_pad_idx=None => pure causal
    x = (params["emb"][trg_seq].astype(jnp.float32) * math.sqrt(D)
         + pe[:T][None, :, :])
    x = x.astype(jnp.bfloat16).reshape(B * T, D)

    for lp in params["layers"]:
        # fused QKV projection: one matmul instead of three
        qkv = pallas_matmul_bias(x, lp["wqkv"], lp["bqkv"])          # (B*T, 3*hd)
        # causal MHA; heads split via lane slices inside the kernel, so no
        # split_heads / merge_heads transposes hit HBM
        attn = pallas_attention(qkv.reshape(B, T, 3 * hd), num_heads, d_k)
        attn = attn.reshape(B * T, hd)
        # output projection + residual + post-LN fused into one kernel
        x1 = pallas_matmul_residual_ln(attn, lp["wo"], lp["bo"], x,
                                       lp["ln1_g"], lp["ln1_b"])
        # position-wise FFN: matmul+bias+ReLU, then matmul+bias+residual+LN
        h = pallas_matmul_bias(x1, lp["w1"], lp["b1"], relu=True)
        x = pallas_matmul_residual_ln(h, lp["w2"], lp["b2"], x1,
                                      lp["ln2_g"], lp["ln2_b"])

    # final LayerNorm fused as prologue of the tied, lane-padded logits head
    logits = pallas_ln_matmul(x, params["lnf_g"], params["lnf_b"],
                              params["head_w"], params["head_b"])
    vocab = params["emb"].shape[0]
    return logits[:, :vocab].reshape(B, T, vocab)


# TODO(synk): Encoder/Decoder class internals are not provided in the source file;
# the src_seq!=None cross-attention branch (and beam-search generate/translate)
# is not implemented — this mirrors the src_seq=None decoder-only path.

if __name__ == "__main__":
    VOCAB = 64        # input_vocab_size == output_vocab_size (tied embeddings)
    D_MODEL = 32
    WORD_MAX_LEN = 16
    NUM_HEADS = 4
    D_K = 8
    LAYERS = 2
    D_FF = 64
    B, T = 2, 8

    key = jax.random.PRNGKey(0)
    key, k_params, k_tok = jax.random.split(key, 3)
    params = init_params(k_params, VOCAB, D_MODEL, NUM_HEADS, D_K, LAYERS, D_FF)
    pe = sinusoidal_pe(WORD_MAX_LEN, D_MODEL)

    trg_seq = jax.random.randint(k_tok, (B, T), 0, VOCAB, dtype=jnp.int32)

    logits = transformer_forward(
        params, trg_seq, d_model=D_MODEL, num_heads=NUM_HEADS, d_k=D_K, pe=pe
    )
    logits = jax.block_until_ready(logits)
    assert logits.shape == (B, T, VOCAB)
    assert bool(jnp.all(jnp.isfinite(logits)))
    print("KERNEL_OK")
</pallas_src>

<mosaic_0001>
module attributes {stable_mosaic.version = 11 : i64} {
  func.func @_mm_bias_kernel(%arg0: i32, %arg1: i32, %arg2: i32, %arg3: memref<16x32xbf16, #tpu.memory_space<vmem>>, %arg4: memref<32x96xbf16, #tpu.memory_space<vmem>>, %arg5: memref<1x96xf32, #tpu.memory_space<vmem>>, %arg6: memref<16x96xbf16, #tpu.memory_space<vmem>>, %arg7: memref<16x96xf32, #tpu.memory_space<vmem>>) attributes {dimension_semantics = [#tpu.dimension_semantics<parallel>, #tpu.dimension_semantics<parallel>, #tpu.dimension_semantics<arbitrary>], iteration_bounds = array<i64: 1, 1, 1>, scalar_prefetch = 0 : i64, scratch_operands = 1 : i64, tpu.core_type = #tpu.core_type<tc>, window_params = [{transform_indices = @transform_0, window_bounds = array<i64: 16, 32>}, {transform_indices = @transform_1, window_bounds = array<i64: 32, 96>}, {transform_indices = @transform_2, window_bounds = array<i64: 1, 96>}, {transform_indices = @transform_3, window_bounds = array<i64: 16, 96>}]} {
    %c0_i32 = arith.constant 0 : i32
    %0 = arith.cmpi eq, %arg2, %c0_i32 : i32
    %1 = arith.extui %0 : i1 to i32
    %c0_i32_0 = arith.constant 0 : i32
    %2 = arith.cmpi ne, %1, %c0_i32_0 : i32
    scf.if %2 {
      %cst_10 = arith.constant 0.000000e+00 : f32
      %12 = vector.broadcast %cst_10 : f32 to vector<16x96xf32>
      %c0_11 = arith.constant 0 : index
      %c0_12 = arith.constant 0 : index
      %13 = vector.load %arg7[%c0_11, %c0_12] : memref<16x96xf32, #tpu.memory_space<vmem>>, vector<16x96xf32>
      tpu.vector_store %arg7[%c0_11, %c0_12], %12 {strides = array<i32>} : memref<16x96xf32, #tpu.memory_space<vmem>>, vector<16x96xf32>,
    } else {
    }
    %c0 = arith.constant 0 : index
    %c0_1 = arith.constant 0 : index
    %3 = vector.load %arg7[%c0, %c0_1] : memref<16x96xf32, #tpu.memory_space<vmem>>, vector<16x96xf32>
    %c0_2 = arith.constant 0 : index
    %c0_3 = arith.constant 0 : index
    %4 = vector.load %arg3[%c0_2, %c0_3] : memref<16x32xbf16, #tpu.memory_space<vmem>>, vector<16x32xbf16>
    %c0_4 = arith.constant 0 : index
    %c0_5 = arith.constant 0 : index
    %5 = vector.load %arg4[%c0_4, %c0_5] : memref<32x96xbf16, #tpu.memory_space<vmem>>, vector<32x96xbf16>
    %cst = arith.constant dense<0.000000e+00> : vector<16x96xf32>
    %6 = tpu.matmul %4, %5, %cst {dimension_numbers = #tpu.dot_dimension_numbers<[1], [0], [0], [1], [0, 0, 1, 1], [], []>} : vector<16x32xbf16>, vector<32x96xbf16>, vector<16x96xf32> -> vector<16x96xf32>
    %7 = arith.addf %3, %6 : vector<16x96xf32>
    %c0_6 = arith.constant 0 : index
    %c0_7 = arith.constant 0 : index
    %8 = vector.load %arg7[%c0_6, %c0_7] : memref<16x96xf32, #tpu.memory_space<vmem>>, vector<16x96xf32>
    tpu.vector_store %arg7[%c0_6, %c0_7], %7 {strides = array<i32>} : memref<16x96xf32, #tpu.memory_space<vmem>>, vector<16x96xf32>,
    %c0_i32_8 = arith.constant 0 : i32
    %9 = arith.cmpi eq, %arg2, %c0_i32_8 : i32
    %10 = arith.extui %9 : i1 to i32
    %c0_i32_9 = arith.constant 0 : i32
    %11 = arith.cmpi ne, %10, %c0_i32_9 : i32
    scf.if %11 {
      %c0_10 = arith.constant 0 : index
      %c0_11 = arith.constant 0 : index
      %12 = vector.load %arg7[%c0_10, %c0_11] : memref<16x96xf32, #tpu.memory_space<vmem>>, vector<16x96xf32>
      %c0_12 = arith.constant 0 : index
      %c0_13 = arith.constant 0 : index
      %13 = vector.load %arg5[%c0_12, %c0_13] : memref<1x96xf32, #tpu.memory_space<vmem>>, vector<1x96xf32>
      %14 = vector.broadcast %13 : vector<1x96xf32> to vector<16x96xf32>
      %15 = arith.addf %12, %14 : vector<16x96xf32>
      %16 = arith.truncf %15 : vector<16x96xf32> to vector<16x96xbf16>
      %c0_14 = arith.constant 0 : index
      %c0_15 = arith.constant 0 : index
      %17 = vector.load %arg6[%c0_14, %c0_15] : memref<16x96xbf16, #tpu.memory_space<vmem>>, vector<16x96xbf16>
      tpu.vector_store %arg6[%c0_14, %c0_15], %16 {strides = array<i32>} : memref<16x96xbf16, #tpu.memory_space<vmem>>, vector<16x96xbf16>,
    } else {
    }
    return
  }
  func.func @transform_0(%arg0: i32, %arg1: i32, %arg2: i32) -> (i32, i32) {
    %c0_i32 = arith.constant 0 : i32
    return %arg0, %arg2 : i32, i32
  }
  func.func @transform_1(%arg0: i32, %arg1: i32, %arg2: i32) -> (i32, i32) {
    %c0_i32 = arith.constant 0 : i32
    return %arg2, %arg1 : i32, i32
  }
  func.func @transform_2(%arg0: i32, %arg1: i32, %arg2: i32) -> (i32, i32) {
    %c0_i32 = arith.constant 0 : i32
    %c0_i32_0 = arith.constant 0 : i32
    return %c0_i32, %arg1 : i32, i32
  }
  func.func @transform_3(%arg0: i32, %arg1: i32, %arg2: i32) -> (i32, i32) {
    %c0_i32 = arith.constant 0 : i32
    return %arg0, %arg1 : i32, i32
  }
}

</mosaic_0001>

<bundles_post_ra>
// kernel: tpu_custom_call.1
= control target key start
LH: loop header
LB: loop body
LE: loop exit
PB: predicated region body
PF: predicated region fallthrough
CT: control target
= control target key end

     0   :  { %8 = vsyncpa [#allocation4], 0  ;;  %s350_s0 = inlined_call_operand.hbm [shape: bf16[16,32], index: 0, kind: input, shape index: {}]   ;;  %s351_s1 = inlined_call_operand.hbm [shape: bf16[32,96], index: 1, kind: input, shape index: {}]   ;;  %s352_s2 = inlined_call_operand.vmem [shape: f32[1,96], index: 2, kind: input, shape index: {}]   ;;  %s353_s3 = inlined_call_operand.hbm [shape: bf16[16,96], index: 3, kind: output, shape index: {}]  }
   0x1   :  { %9 = vsyncpa [#allocation7], 0 }
   0x2   :  { %10 = vsyncpa [#allocation5], 0  ;;  %s271_s12 = smov [#allocation3]   ;;  %s199_s16 = scalar_lea.hbm %s350_s0, 128 }
   0x3   :  { %s16_s13 = sshll.u32 %s271_s12, 4  ;;  %p200_p0 = scmp.ne.s32.totalorder %s350_s0, %s199_s16  ;;  %s17_s13 = int_to_ptr.vmem [resolvable:$true] %s16_s13 }
   0x4   :  { %p203_p1 = scmp.lt.u32.totalorder %s199_s16, %s350_s0 }
   0x6   :  { %p205_p2 = pnand %p203_p1, %p200_p0 }
   0x8   :  { %208 = shalt.err (!%p205_p2)
}
   0x9   :  { %s209_s21 = scalar_lea.vmem %s17_s13, 128  ;;  %p214_p4 = scmp.lt.s32.totalorder %s17_s13, %s17_s13 }
   0xa   :  { %p210_p3 = scmp.ne.s32.totalorder %s17_s13, %s209_s21  ;;  %p215_p5 = scmp.lt.s32.totalorder %s209_s21, %s209_s21 }
   0xc   :  { %p216_p6 = por %p215_p5, %p214_p4 }
   0xe   :  { %p217_p7 = pnand %p216_p6, %p210_p3 }
  0x10   :  { %220 = shalt.err (!%p217_p7)
}
  0x11   :  { %s272_s22 = smov 64   ;;  %s273_s23 = smov 4  }
  0x12   :  { %22 = dma.hbm_to_vmem [thread:$0]  %s350_s0, 128, %s17_s13, [#allocation4], %s272_s22, %s272_s22, %s273_s23  }
  0x13   :  { %s274_s26 = smov [#allocation6]   ;;  %s221_s30 = scalar_lea.hbm %s351_s1, 256 }
  0x14   :  { %s28_s27 = sshll.u32 %s274_s26, 4  ;;  %p222_p8 = scmp.ne.s32.totalorder %s351_s1, %s221_s30  ;;  %s29_s27 = int_to_ptr.vmem [resolvable:$true] %s28_s27 }
  0x15   :  { %p225_p9 = scmp.lt.u32.totalorder %s221_s30, %s351_s1 }
  0x17   :  { %p227_p10 = pnand %p225_p9, %p222_p8 }
  0x19   :  { %230 = shalt.err (!%p227_p10)
}
  0x1a   :  { %s231_s8 = scalar_lea.vmem %s29_s27, 256  ;;  %p236_p12 = scmp.lt.s32.totalorder %s29_s27, %s29_s27 }
  0x1b   :  { %p232_p11 = scmp.ne.s32.totalorder %s29_s27, %s231_s8  ;;  %p237_p13 = scmp.lt.s32.totalorder %s231_s8, %s231_s8 }
  0x1d   :  { %p238_p0 = por %p237_p13, %p236_p12 }
  0x1f   :  { %p239_p1 = pnand %p238_p0, %p232_p11 }
  0x21   :  { %242 = shalt.err (!%p239_p1)
}
  0x22   :  { %34 = dma.hbm_to_vmem [thread:$0]  %s351_s1, 256, %s29_s27, [#allocation7], %s272_s22, %s272_s22, %s273_s23  }
  0x23   :  { %265 = dma.done.wait [#allocation4], 128  }
  0x24   :  { %266 = vsyncadd [#allocation4], 4294967168 }
  0x25   :  { %267 = dma.done.wait [#allocation7], 256  }
  0x26   :  { %268 = vsyncadd [#allocation7], 4294967040  ;;  %vm48_vm0 = vcmask 785408   ;;  %v275_v0 = vmov 0.0   ;;  %vm276_vm1 = vmmov 0   ;;  %v196_v1 = vld [vmem:[#allocation6] sm:$0xff]  }
  0x27   :  { %49 = vst.msk [vmem:[#allocation2] sm:$0xff] %vm48_vm0, %v275_v0  ;;  %50 = vst.msk [vmem:[#allocation2 + $0x8] sm:$0xff] %vm48_vm0, %v275_v0  ;;  %181 = vmatprep.subr.bf16.mxu0 %v275_v0  ;;  %185 = vmatprep.mubr.msk.bf16.mxu0 %vm276_vm1, %v275_v0  ;;  %v197_v2 = vld [vmem:[#allocation6 + $0x8] sm:$0xff]   ;;  %v198_v3 = vld [vmem:[#allocation3] sm:$0xff]   ;;  %vm76_vm2 = vcmask 261120   ;;  %vm148_vm3 = vcmask 781312  }
  0x28   :  { %182 = vmatpush3.bf16.msra.mxu0 %v196_v1  ;;  %v173_v12 = vld [vmem:[%s352_s2] ss:$0 sm:$0xff]  ;;  %s277_s11 = smov [#allocation8]  }
  0x29   :  { %183 = vmatprep.subr.bf16.mxu0 %v275_v0  ;;  %s156_s12 = sshll.u32 %s277_s11, 4  ;;  %s157_s12 = int_to_ptr.vmem [resolvable:$true] %s156_s12 }
  0x2a   :  { %s243_s13 = scalar_lea.vmem %s157_s12, 128  ;;  %p248_p3 = scmp.lt.s32.totalorder %s157_s12, %s157_s12 }
  0x2b   :  { %p244_p2 = scmp.ne.s32.totalorder %s157_s12, %s243_s13  ;;  %p249_p4 = scmp.lt.s32.totalorder %s243_s13, %s243_s13 }
  0x2c   :  { %184 = vmatpush3.bf16.msra.mxu0 %v197_v2 }
  0x2d   :  { %p250_p5 = por %p249_p4, %p248_p3 }
  0x2e   :  { %v51_v4 = vld [vmem:[#allocation2] sm:$0xff]  ;;  %v52_v6 = vld [vmem:[#allocation2 + $0x8] sm:$0xff] }
  0x2f   :  { %186 = vmatmul.mubr.msk.bf16.vlgmr.msra.gmra.mrb[0].mxu0 %vm76_vm2, %v198_v3  ;;  %p251_p6 = pnand %p250_p5, %p244_p2 }
 0x102   :  { %v114_v5 = vpop.f32.mrb[0].mxu0 }
 0x103   :  { %v121_v7 = vadd.f32 %v114_v5, %v51_v4  ;;  %v187_v8 = vpop.f32.mrb[1].mxu0 }
 0x104   :  { %v117_v9 = vpop.f32.mrb[2].mxu0 }
 0x105   :  { %124 = vst.msk [vmem:[#allocation2] sm:$0xff] %vm48_vm0, %v121_v7  ;;  %v122_v10 = vadd.f32 %v117_v9, %v52_v6  ;;  %v188_v11 = vpop.f32.mrb[3].mxu0 }
 0x107   :  { %125 = vst.msk [vmem:[#allocation2 + $0x8] sm:$0xff] %vm48_vm0, %v122_v10 }
 0x10c   :  { %v129_v13 = vld [vmem:[#allocation2] sm:$0xff] }
 0x10d   :  { %v138_v14 = vadd.f32 %v173_v12, %v129_v13 }
 0x10e   :  { %v130_v15 = vld [vmem:[#allocation2 + $0x8] sm:$0xff] }
 0x10f   :  { %v139_v16 = vadd.f32 %v173_v12, %v130_v15  ;;  %v176_v17 = vpack.c.bf16 %v138_v14, %v138_v14 }
 0x111   :  { %v177_v18 = vpack.c.bf16 %v139_v16, %v139_v16  ;;  %149 = vst.msk [vmem:[#allocation8] sm:$0xf] %vm148_vm3, %v176_v17 }
 0x113   :  { %150 = vst.msk [vmem:[#allocation8 + $0x4] sm:$0xf] %vm148_vm3, %v177_v18 }
 0x114   :  { %254 = shalt.err (!%p251_p6)
}
 0x115   :  { %s255_s15 = scalar_lea.hbm %s353_s3, 128 }
 0x116   :  { %p256_p7 = scmp.ne.s32.totalorder %s353_s3, %s255_s15  ;;  %p259_p8 = scmp.lt.u32.totalorder %s255_s15, %s353_s3 }
 0x118   :  { %p261_p9 = pnand %p259_p8, %p256_p7 }
 0x11a   :  { %264 = shalt.err (!%p261_p9)
}
 0x11b   :  { %162 = dma.vmem_to_hbm [thread:$0]  %s157_s12, 128, %s353_s3, [#allocation5], %s272_s22, %s272_s22, %s273_s23  }
 0x11c   :  { %269 = dma.done.wait [#allocation5], 128  }
 0x11d   :  { %270 = vsyncadd [#allocation5], 4294967168 }
 0x11e   :  { %166 = vsyncpa [#allocation4], 1 }
 0x11f   :  { %167 = vsyncpa [#allocation7], 1 }
 0x120   :  { %168 = vsyncpa [#allocation5], 1 }

</bundles_post_ra>
